<compile_context>
chip_gen: v7x
topology: tpu7x:2x2x1
jax: 0.10.0
libtpu: 0.0.40
codegen_flags: <defaults>
</compile_context>

<pallas_src>
import functools

import jax
import jax.numpy as jnp
from jax.experimental import pallas as pl
from jax.experimental.pallas import tpu as pltpu


def _ffn_kernel(x_ref, w1_ref, b1_ref, w2_ref, b2_ref, o_ref, acc_ref):
    f = pl.program_id(1)

    @pl.when(f == 0)
    def _init():
        # Hoist the second-layer bias into the accumulator init.
        acc_ref[...] = jnp.broadcast_to(
            b2_ref[...].astype(jnp.float32), acc_ref.shape)

    # First linear (this d_ff chunk) + bias + ReLU, fused.
    h = jnp.dot(x_ref[...], w1_ref[...], preferred_element_type=jnp.float32)
    h = jnp.maximum(h + b1_ref[...], 0.0)
    # Dropout is identity in eval mode.
    # TODO(synk): add pltpu.prng_random_bits-based dropout mask if train-mode
    #             stochastic dropout is required.

    # Second linear: accumulate this chunk's contribution in f32.
    acc_ref[...] += jnp.dot(h.astype(w2_ref.dtype), w2_ref[...],
                            preferred_element_type=jnp.float32)

    @pl.when(f == pl.num_programs(1) - 1)
    def _finalize():
        o_ref[...] = acc_ref[...].astype(o_ref.dtype)


def _cdiv(a, b):
    return -(-a // b)


def _round_up(v, n):
    return _cdiv(v, n) * n


def _vmem_capacity_bytes():
    """Per-core VMEM capacity; conservative fallback if the query fails."""
    try:
        cap = int(pltpu.get_tpu_info().vmem_capacity_bytes)
        if cap > 0:
            return cap
    except Exception:
        pass
    return 64 * 2 ** 20  # smallest per-TC VMEM across v5e/v6e/v7x


def _vmem_footprint(tm, tf, d_model, x_bytes, w_bytes):
    """Estimated VMEM footprint of one grid step (double-buffered tiles)."""
    return (4 * tm * d_model * x_bytes          # x tile + out tile (2 bufs each)
            + tm * d_model * 4                  # f32 accumulator scratch
            + 4 * d_model * tf * w_bytes        # W1 + W2 chunks (2 bufs each)
            + 2 * 8 * (tf + d_model) * w_bytes)  # biases (sublane-padded)


def _select_tiles(m, d_model, d_ff_pad, x_bytes, w_bytes, budget, tm_max, sublane):
    """Pick (tm, m_pad, tf) from the VMEM budget.

    Preference order: resident weights > large tm > large tf; tf is shrunk
    before tm because tm sets the weight-reuse ratio (flops / weight byte).
    """
    def footprint(tm, tf):
        return _vmem_footprint(tm, tf, d_model, x_bytes, w_bytes)

    def row_tiling(tm_cap, min_tiles):
        n_tiles = max(_cdiv(m, tm_cap), min_tiles)
        tm = _round_up(_cdiv(m, n_tiles), sublane)
        m_pad = _round_up(m, tm)
        return tm, m_pad

    # Whole-weight residency: constant weight block index across the grid, so
    # W1/W2 are DMA'd from HBM exactly once for the entire call.
    resident = footprint(sublane, d_ff_pad) <= budget
    if resident:
        tf_candidates = [d_ff_pad]
        # Give the "parallel" row axis >= 2 tiles so both v7x TensorCores get
        # work; resident weights => splitting rows adds no HBM traffic.
        min_tiles = 2 if m > sublane else 1
    else:
        tf_candidates = [t for t in (512, 256, 128)
                         if t <= d_ff_pad and d_ff_pad % t == 0]
        if not tf_candidates:      # d_ff_pad is a multiple of 128, so unreachable
            tf_candidates = [128]
        # Chunked weights are re-streamed per row tile -> don't force extra tiles.
        min_tiles = 1

    tm_cap = max(tm_max, sublane)
    while True:
        tm, m_pad = row_tiling(tm_cap, min_tiles)
        for tf in tf_candidates:          # shrink tf before tm
            if footprint(tm, tf) <= budget:
                return tm, m_pad, tf
        if tm_cap <= sublane:
            break
        tm_cap = max(tm_cap // 2, sublane)

    # Fallback: smallest row tile + smallest d_ff chunk even if over budget;
    # the compiler may still fit it (vmem_limit is raised accordingly).
    tm, m_pad = row_tiling(sublane, 1)
    return tm, m_pad, tf_candidates[-1]


@functools.partial(jax.jit, static_argnames=("tm_max", "vmem_budget_bytes"))
def feed_forward(x, w1_t, b1, w2_t, b2, *, tm_max=512, vmem_budget_bytes=None):
    """x: (batch, seq, d_model). w1_t: (d_model, d_ff). w2_t: (d_ff, d_model).

    vmem_budget_bytes overrides the tile-selection budget (testing only); the
    actual compiler vmem limit always comes from the hardware query.
    """
    batch, seq, d_model = x.shape
    d_ff = w1_t.shape[1]
    m = batch * seq

    x_bytes = jnp.dtype(x.dtype).itemsize
    w_bytes = jnp.dtype(w1_t.dtype).itemsize
    sublane = max(8, 32 // x_bytes)   # 8 (f32), 16 (bf16), 32 (int8/fp8)

    vmem_cap = _vmem_capacity_bytes()
    hw_budget = int(vmem_cap * 0.85)          # headroom for compiler scratch/sems
    tile_budget = hw_budget if vmem_budget_bytes is None else int(vmem_budget_bytes)

    # Pad d_ff to a lane multiple. Zero W1 columns / b1 entries / W2 rows
    # contribute exactly zero through ReLU and the second matmul.
    d_ff_pad = _round_up(d_ff, 128)

    tm, m_pad, tf = _select_tiles(m, d_model, d_ff_pad, x_bytes, w_bytes,
                                  tile_budget, tm_max, sublane)

    x2d = x.reshape(m, d_model)
    if m_pad != m:
        x2d = jnp.pad(x2d, ((0, m_pad - m), (0, 0)))
    if d_ff_pad != d_ff:
        w1_t = jnp.pad(w1_t, ((0, 0), (0, d_ff_pad - d_ff)))
        b1 = jnp.pad(b1, (0, d_ff_pad - d_ff))
        w2_t = jnp.pad(w2_t, ((0, d_ff_pad - d_ff), (0, 0)))
    b1_2d = b1.reshape(1, d_ff_pad)
    b2_2d = b2.reshape(1, d_model)

    grid = (m_pad // tm, d_ff_pad // tf)
    row_tiles = grid[0]
    weights_resident = (tf == d_ff_pad)

    footprint = _vmem_footprint(tm, tf, d_model, x_bytes, w_bytes)
    vmem_limit = int(min(vmem_cap, max(hw_budget, footprint + (2 << 20))))

    # Weights are DMA'd once when resident (constant block index across the
    # whole grid), otherwise re-streamed once per row tile.
    weight_reads = 1 if weights_resident else row_tiles
    cost = pl.CostEstimate(
        flops=2 * 2 * m_pad * d_model * d_ff_pad,             # two matmuls
        transcendentals=0,
        bytes_accessed=(2 * m_pad * d_model * x_bytes          # x in + out
                        + weight_reads * 2 * d_model * d_ff_pad * w_bytes
                        + (d_ff_pad + d_model) * w_bytes),      # biases
    )

    out2d = pl.pallas_call(
        _ffn_kernel,
        out_shape=jax.ShapeDtypeStruct((m_pad, d_model), x.dtype),
        grid_spec=pltpu.PrefetchScalarGridSpec(
            num_scalar_prefetch=0,
            grid=grid,
            in_specs=[
                pl.BlockSpec((tm, d_model), lambda i, f: (i, 0)),    # x rows
                pl.BlockSpec((d_model, tf), lambda i, f: (0, f)),    # W1^T chunk
                pl.BlockSpec((1, tf), lambda i, f: (0, f)),          # b1 chunk
                pl.BlockSpec((tf, d_model), lambda i, f: (f, 0)),    # W2^T chunk
                pl.BlockSpec((1, d_model), lambda i, f: (0, 0)),     # b2
            ],
            out_specs=pl.BlockSpec((tm, d_model), lambda i, f: (i, 0)),
            scratch_shapes=[pltpu.VMEM((tm, d_model), jnp.float32)],
        ),
        compiler_params=pltpu.CompilerParams(
            dimension_semantics=("parallel", "arbitrary"),
            vmem_limit_bytes=vmem_limit,
        ),
        cost_estimate=cost,
    )(x2d, w1_t, b1_2d, w2_t, b2_2d)

    return out2d[:m].reshape(batch, seq, d_model)


def init_params(key, d_model, d_ff, dtype=jnp.float32):
    """Deterministic init mimicking nn.Linear (uniform +- 1/sqrt(fan_in))."""
    k1, k2, k3, k4 = jax.random.split(key, 4)
    lim1 = 1.0 / jnp.sqrt(d_model)
    lim2 = 1.0 / jnp.sqrt(d_ff)
    # PyTorch stores W1 as (d_ff, d_model); we keep it transposed for the kernel.
    w1_t = jax.random.uniform(k1, (d_model, d_ff), dtype, -lim1, lim1)
    b1 = jax.random.uniform(k2, (d_ff,), dtype, -lim1, lim1)
    w2_t = jax.random.uniform(k3, (d_ff, d_model), dtype, -lim2, lim2)
    b2 = jax.random.uniform(k4, (d_model,), dtype, -lim2, lim2)
    return w1_t, b1, w2_t, b2


def _reference(x, w1_t, b1, w2_t, b2):
    return jnp.maximum(x @ w1_t + b1, 0.0) @ w2_t + b2


if __name__ == "__main__":
    key = jax.random.PRNGKey(0)

    # 1) Small primary config (matches the toy module sizes); exercises the
    #    d_ff -> 128 zero-padding path and resident weights.
    batch, seq, d_model, d_ff = 2, 8, 32, 64
    kx, kp = jax.random.split(key)
    x = jax.random.normal(kx, (batch, seq, d_model), jnp.float32)
    w1_t, b1, w2_t, b2 = init_params(kp, d_model, d_ff)
    out = jax.block_until_ready(feed_forward(x, w1_t, b1, w2_t, b2))
    ref = _reference(x, w1_t, b1, w2_t, b2)
    assert out.shape == (batch, seq, d_model)
    assert jnp.allclose(out, ref, atol=1e-4, rtol=1e-4)

    # 2) Resident-weight path with uneven row count (balanced 2-way row split).
    batch2, seq2, dm2, dff2 = 3, 40, 128, 384
    kx2, kp2 = jax.random.split(kp)
    x2 = jax.random.normal(kx2, (batch2, seq2, dm2), jnp.float32)
    p2 = init_params(kp2, dm2, dff2)
    out2 = jax.block_until_ready(feed_forward(x2, *p2))
    ref2 = _reference(x2, *p2)
    assert out2.shape == (batch2, seq2, dm2)
    assert jnp.allclose(out2, ref2, atol=2e-3, rtol=2e-3)

    # 2b) Same shape, but force a tiny tile budget so the chunked-d_ff
    #     (reduction-axis accumulator) path is exercised: tf=128, 3 f-chunks.
    out2b = jax.block_until_ready(
        feed_forward(x2, *p2, vmem_budget_bytes=512 * 1024))
    assert jnp.allclose(out2b, ref2, atol=2e-3, rtol=2e-3)

    # 3) m=400: balanced row tiling gives tm=200 / m_pad=400 (zero padding waste).
    batch3, seq3, dm3, dff3 = 2, 200, 128, 256
    kx3, kp3 = jax.random.split(kp2)
    x3 = jax.random.normal(kx3, (batch3, seq3, dm3), jnp.float32)
    p3 = init_params(kp3, dm3, dff3)
    out3 = jax.block_until_ready(feed_forward(x3, *p3))
    ref3 = _reference(x3, *p3)
    assert out3.shape == (batch3, seq3, dm3)
    assert jnp.allclose(out3, ref3, atol=2e-3, rtol=2e-3)

    print("KERNEL_OK")
</pallas_src>

<mosaic_0001>
module attributes {stable_mosaic.version = 11 : i64} {
  func.func @_ffn_kernel(%arg0: i32, %arg1: i32, %arg2: memref<8x32xf32, #tpu.memory_space<vmem>>, %arg3: memref<32x128xf32, #tpu.memory_space<vmem>>, %arg4: memref<1x128xf32, #tpu.memory_space<vmem>>, %arg5: memref<128x32xf32, #tpu.memory_space<vmem>>, %arg6: memref<1x32xf32, #tpu.memory_space<vmem>>, %arg7: memref<8x32xf32, #tpu.memory_space<vmem>>, %arg8: memref<8x32xf32, #tpu.memory_space<vmem>>) attributes {dimension_semantics = [#tpu.dimension_semantics<parallel>, #tpu.dimension_semantics<arbitrary>], iteration_bounds = array<i64: 2, 1>, scalar_prefetch = 0 : i64, scratch_operands = 1 : i64, tpu.core_type = #tpu.core_type<tc>, window_params = [{transform_indices = @transform_0, window_bounds = array<i64: 8, 32>}, {transform_indices = @transform_1, window_bounds = array<i64: 32, 128>}, {transform_indices = @transform_2, window_bounds = array<i64: 1, 128>}, {transform_indices = @transform_3, window_bounds = array<i64: 128, 32>}, {pipeline_mode = #tpu.pipeline_mode<synchronous>, transform_indices = @transform_4, window_bounds = array<i64: 1, 32>}, {transform_indices = @transform_5, window_bounds = array<i64: 8, 32>}]} {
    %c0_i32 = arith.constant 0 : i32
    %0 = arith.cmpi eq, %arg1, %c0_i32 : i32
    %1 = arith.extui %0 : i1 to i32
    %c0_i32_0 = arith.constant 0 : i32
    %2 = arith.cmpi ne, %1, %c0_i32_0 : i32
    scf.if %2 {
      %c0_16 = arith.constant 0 : index
      %c0_17 = arith.constant 0 : index
      %19 = vector.load %arg6[%c0_16, %c0_17] : memref<1x32xf32, #tpu.memory_space<vmem>>, vector<1x32xf32>
      %20 = vector.shape_cast %19 : vector<1x32xf32> to vector<1x32xf32>
      %21 = vector.broadcast %20 : vector<1x32xf32> to vector<8x32xf32>
      %c0_18 = arith.constant 0 : index
      %c0_19 = arith.constant 0 : index
      %22 = vector.load %arg8[%c0_18, %c0_19] : memref<8x32xf32, #tpu.memory_space<vmem>>, vector<8x32xf32>
      tpu.vector_store %arg8[%c0_18, %c0_19], %21 {strides = array<i32>} : memref<8x32xf32, #tpu.memory_space<vmem>>, vector<8x32xf32>,
    } else {
    }
    %c0 = arith.constant 0 : index
    %c0_1 = arith.constant 0 : index
    %3 = vector.load %arg2[%c0, %c0_1] : memref<8x32xf32, #tpu.memory_space<vmem>>, vector<8x32xf32>
    %c0_2 = arith.constant 0 : index
    %c0_3 = arith.constant 0 : index
    %4 = vector.load %arg3[%c0_2, %c0_3] : memref<32x128xf32, #tpu.memory_space<vmem>>, vector<32x128xf32>
    %cst = arith.constant dense<0.000000e+00> : vector<8x128xf32>
    %5 = tpu.matmul %3, %4, %cst {dimension_numbers = #tpu.dot_dimension_numbers<[1], [0], [0], [1], [0, 0, 1, 1], [], []>} : vector<8x32xf32>, vector<32x128xf32>, vector<8x128xf32> -> vector<8x128xf32>
    %c0_4 = arith.constant 0 : index
    %c0_5 = arith.constant 0 : index
    %6 = vector.load %arg4[%c0_4, %c0_5] : memref<1x128xf32, #tpu.memory_space<vmem>>, vector<1x128xf32>
    %7 = vector.broadcast %6 : vector<1x128xf32> to vector<8x128xf32>
    %8 = arith.addf %5, %7 : vector<8x128xf32>
    %cst_6 = arith.constant 0.000000e+00 : f32
    %9 = vector.broadcast %cst_6 : f32 to vector<8x128xf32>
    %10 = arith.maximumf %8, %9 : vector<8x128xf32>
    %c0_7 = arith.constant 0 : index
    %c0_8 = arith.constant 0 : index
    %11 = vector.load %arg8[%c0_7, %c0_8] : memref<8x32xf32, #tpu.memory_space<vmem>>, vector<8x32xf32>
    %c0_9 = arith.constant 0 : index
    %c0_10 = arith.constant 0 : index
    %12 = vector.load %arg5[%c0_9, %c0_10] : memref<128x32xf32, #tpu.memory_space<vmem>>, vector<128x32xf32>
    %cst_11 = arith.constant dense<0.000000e+00> : vector<8x32xf32>
    %13 = tpu.matmul %10, %12, %cst_11 {dimension_numbers = #tpu.dot_dimension_numbers<[1], [0], [0], [1], [0, 0, 1, 1], [], []>} : vector<8x128xf32>, vector<128x32xf32>, vector<8x32xf32> -> vector<8x32xf32>
    %14 = arith.addf %11, %13 : vector<8x32xf32>
    %c0_12 = arith.constant 0 : index
    %c0_13 = arith.constant 0 : index
    %15 = vector.load %arg8[%c0_12, %c0_13] : memref<8x32xf32, #tpu.memory_space<vmem>>, vector<8x32xf32>
    tpu.vector_store %arg8[%c0_12, %c0_13], %14 {strides = array<i32>} : memref<8x32xf32, #tpu.memory_space<vmem>>, vector<8x32xf32>,
    %c0_i32_14 = arith.constant 0 : i32
    %16 = arith.cmpi eq, %arg1, %c0_i32_14 : i32
    %17 = arith.extui %16 : i1 to i32
    %c0_i32_15 = arith.constant 0 : i32
    %18 = arith.cmpi ne, %17, %c0_i32_15 : i32
    scf.if %18 {
      %c0_16 = arith.constant 0 : index
      %c0_17 = arith.constant 0 : index
      %19 = vector.load %arg8[%c0_16, %c0_17] : memref<8x32xf32, #tpu.memory_space<vmem>>, vector<8x32xf32>
      %c0_18 = arith.constant 0 : index
      %c0_19 = arith.constant 0 : index
      %20 = vector.load %arg7[%c0_18, %c0_19] : memref<8x32xf32, #tpu.memory_space<vmem>>, vector<8x32xf32>
      tpu.vector_store %arg7[%c0_18, %c0_19], %19 {strides = array<i32>} : memref<8x32xf32, #tpu.memory_space<vmem>>, vector<8x32xf32>,
    } else {
    }
    return
  }
  func.func @transform_0(%arg0: i32, %arg1: i32) -> (i32, i32) {
    %c0_i32 = arith.constant 0 : i32
    %c0_i32_0 = arith.constant 0 : i32
    return %arg0, %c0_i32 : i32, i32
  }
  func.func @transform_1(%arg0: i32, %arg1: i32) -> (i32, i32) {
    %c0_i32 = arith.constant 0 : i32
    %c0_i32_0 = arith.constant 0 : i32
    return %c0_i32, %arg1 : i32, i32
  }
  func.func @transform_2(%arg0: i32, %arg1: i32) -> (i32, i32) {
    %c0_i32 = arith.constant 0 : i32
    %c0_i32_0 = arith.constant 0 : i32
    return %c0_i32, %arg1 : i32, i32
  }
  func.func @transform_3(%arg0: i32, %arg1: i32) -> (i32, i32) {
    %c0_i32 = arith.constant 0 : i32
    %c0_i32_0 = arith.constant 0 : i32
    return %arg1, %c0_i32 : i32, i32
  }
  func.func @transform_4(%arg0: i32, %arg1: i32) -> (i32, i32) {
    %c0_i32 = arith.constant 0 : i32
    %c0_i32_0 = arith.constant 0 : i32
    %c0_i32_1 = arith.constant 0 : i32
    return %c0_i32, %c0_i32_0 : i32, i32
  }
  func.func @transform_5(%arg0: i32, %arg1: i32) -> (i32, i32) {
    %c0_i32 = arith.constant 0 : i32
    %c0_i32_0 = arith.constant 0 : i32
    return %arg0, %c0_i32 : i32, i32
  }
}

</mosaic_0001>

<bundles_post_ra>
// kernel: feed_forward.1
= control target key start
LH: loop header
LB: loop body
LE: loop exit
PB: predicated region body
PF: predicated region fallthrough
CT: control target
= control target key end

     0   :  { %10 = vsyncpa [#allocation4], 0  ;;  %s1071_s0 = inlined_call_operand.vmem [shape: f32[16,32], index: 0, kind: input, shape index: {}]   ;;  %s1072_s1 = inlined_call_operand.vmem [shape: f32[32,128], index: 1, kind: input, shape index: {}]   ;;  %s1073_s2 = inlined_call_operand.vmem [shape: f32[1,128], index: 2, kind: input, shape index: {}]   ;;  %s1074_s3 = inlined_call_operand.vmem [shape: f32[128,32], index: 3, kind: input, shape index: {}]   ;;  %s1075_s4 = inlined_call_operand.vmem [shape: f32[1,32], index: 4, kind: input, shape index: {}]   ;;  %s1076_s5 = inlined_call_operand.hbm [shape: f32[16,32], index: 5, kind: output, shape index: {}]  }
   0x1   :  { %12 = vsyncpa [#allocation4 + $0x1], 0  ;;  %s889_s18 = smov 0   ;;  %s891_s19 = smov 0  }
   0x2   :  { %s893_s20 = smov 0   ;;  %s895_s21 = smov 0  }
   0x3   :  { %s897_s22 = smov 0   ;;  %s899_s23 = smov 0  }
   0x4 LB: > { %s602_s24 = sadd.s32 4294967295, %s853_s23   ;;  %s603_s25 = sadd.s32 4294967294, %s853_s23   ;;  %s853_s23 = sphi %s899_s23, %s18_s23   ;;  %s849_s22 = sphi %s897_s22, %s1083_s22   ;;  %s845_s21 = sphi %s895_s21, %s1082_s21   ;;  %s841_s20 = sphi %s893_s20, %s1081_s20   ;;  %s837_s19 = sphi %s891_s19, %s1080_s19   ;;  %s833_s18 = sphi %s889_s18, %s1079_s18  }
   0x5   : > { %s30_s26 = sadd.s32 1, %s849_s22  ;;  %s162_s27 = sadd.s32 1, %s841_s20 }
   0x6   : > { %p32_p0 = scmp.ge.s32.totalorder %s30_s26, 2  ;;  %p172_p1 = scmp.ne.s32.totalorder %s841_s20, %s837_s19 }
   0x7   : > { %p173_p2 = scmp.eq.s32.totalorder %s602_s24, 1  ;;  %p178_p3 = scmp.ne.s32.totalorder %s837_s19, %s833_s18 }
   0x8   : > { %s1085_s26 = smov (%p32_p0, %s30_s26), 0  ;;  %p179_p5 = scmp.eq.s32.totalorder %s603_s25, 1 }
   0x9   : > { %p929_p4 = por %p173_p2, %p172_p1  ;;  %s159_s29 = ssub.s32 %s849_s22, %s1085_s26 }
   0xa   : > { %p609_p6 = scmp.ge.s32.totalorder %s853_s23, 1  ;;  %p160_p7 = scmp.eq.s32.totalorder %s159_s29, 0 }
   0xb   : > { %p936_p8 = por %p179_p5, %p178_p3  ;;  %p229_p9 = scmp.lt.s32.totalorder %s853_s23, 3 }
   0xc   : > { %s942_s6 = scalar_select %p160_p7, %s841_s20, %s162_s27  }
   0xd   : > { %p230_p10 = pnand %p609_p6, %p229_p9 }
   0xe   : > { %v299_v0 = vld [vmem:[%s1072_s1] sm:$0xff] (!%p230_p10)  ;;  %v300_v1 = vld [vmem:[%s1072_s1 + $0x8] sm:$0xff] (!%p230_p10)  ;;  %v301_v2 = vld [vmem:[%s1072_s1 + $0x10] sm:$0xff] (!%p230_p10)  ;;  %v855_v3 = vmov (!%p230_p10), 0.0|0.0   ;;  %vm856_vm0 = vmmov (!%p230_p10), 0   ;;  %v857_v6 = vmov (!%p230_p10), 0.0  }
   0xf   : > { %233 = sbr.rel (%p230_p10) target bundleno = 479 (0x1df), region = 40  ;;  %687 = vmatprep.subr.bf16.mxu0 (!%p230_p10), %v855_v3  ;;  %v688_v4 = vpack.c.bf16 (!%p230_p10), %v300_v1, %v299_v0  ;;  %v302_v5 = vld [vmem:[%s1072_s1 + $0x18] sm:$0xff] (!%p230_p10)  ;;  %649 = vmatprep.mubr.msk.f32.mxu0 (!%p230_p10), %vm856_vm0, %v857_v6  ;;  %p268_p11 = scmp.lt.s32.totalorder (!%p230_p10), %s845_s21, 1  ;;  %v612_v7 = vld [vmem:[%s1075_s4] ss:$0 sm:$0xff] (!%p230_p10)  ;;  %vm296_vm1 = vcmask (!%p230_p10), 261120  }
  0x10   : > { %v386_v8 = vld [vmem:[%s1074_s3] sm:$0xff] (!%p230_p10)  ;;  %297 = vst.msk [vmem:[#allocation2] sm:$0xff] (!%p230_p10), %vm296_vm1, %v612_v7  ;;  %693 = vmatprep.subr.bf16.mxu1 (!%p230_p10), %v855_v3  ;;  %v387_v9 = vld [vmem:[%s1074_s3 + $0x8] sm:$0xff] (!%p230_p10)  ;;  %v388_v10 = vld [vmem:[%s1074_s3 + $0x10] sm:$0xff] (!%p230_p10)  ;;  %684 = vmatprep.mubr.msk.f32.mxu1 (!%p230_p10), %vm856_vm0, %v857_v6  ;;  %v691_v12 = vpack.c.bf16 (!%p230_p10), %v302_v5, %v301_v2  ;;  %s616_s13 = sshll.u32 (!%p230_p10), %s845_s21, 7 }
  0x11   : > { %v389_v11 = vld [vmem:[%s1074_s3 + $0x18] sm:$0xff] (!%p230_p10)  ;;  %689 = vmatpush3.bf16.msra.mxu0 (!%p230_p10), %v688_v4  ;;  %v694_v13 = vpack.c.bf16 (!%p230_p10), %v387_v9, %v386_v8  ;;  %v390_v15 = vld [vmem:[%s1074_s3 + $0x20] sm:$0xff] (!%p230_p10)  ;;  %v391_v16 = vld [vmem:[%s1074_s3 + $0x28] sm:$0xff] (!%p230_p10)  ;;  %s1023_s24 = scalar_lea.hbm (!%p230_p10), %s1076_s5, %s616_s13 }
  0x12   : > { %690 = vmatprep.subr.bf16.mxu0 (!%p230_p10), %v855_v3  ;;  %v697_v14 = vpack.c.bf16 (!%p230_p10), %v389_v11, %v388_v10  ;;  %v700_v18 = vpack.c.bf16 (!%p230_p10), %v391_v16, %v390_v15  ;;  %v392_v19 = vld [vmem:[%s1074_s3 + $0x30] sm:$0xff] (!%p230_p10)  ;;  %v393_v20 = vld [vmem:[%s1074_s3 + $0x38] sm:$0xff] (!%p230_p10)  ;;  %v394_v22 = vld [vmem:[%s1074_s3 + $0x40] sm:$0xff] (!%p230_p10) }
  0x13   : > { %695 = vmatpush3.bf16.msra.mxu1 (!%p230_p10), %v694_v13  ;;  %v703_v21 = vpack.c.bf16 (!%p230_p10), %v393_v20, %v392_v19  ;;  %v395_v23 = vld [vmem:[%s1074_s3 + $0x48] sm:$0xff] (!%p230_p10)  ;;  %v396_v25 = vld [vmem:[%s1074_s3 + $0x50] sm:$0xff] (!%p230_p10)  ;;  %v397_v26 = vld [vmem:[%s1074_s3 + $0x58] sm:$0xff] (!%p230_p10) }
  0x14   : > { %696 = vmatprep.subr.bf16.mxu1 (!%p230_p10), %v855_v3  ;;  %v706_v24 = vpack.c.bf16 (!%p230_p10), %v395_v23, %v394_v22  ;;  %v709_v27 = vpack.c.bf16 (!%p230_p10), %v397_v26, %v396_v25  ;;  %v398_v28 = vld [vmem:[%s1074_s3 + $0x60] sm:$0xff] (!%p230_p10)  ;;  %v399_v29 = vld [vmem:[%s1074_s3 + $0x68] sm:$0xff] (!%p230_p10)  ;;  %v400_v31 = vld [vmem:[%s1074_s3 + $0x70] sm:$0xff] (!%p230_p10) }
  0x15   : > { %692 = vmatpush3.bf16.msra.mxu0 (!%p230_p10), %v691_v12  ;;  %v712_v30 = vpack.c.bf16 (!%p230_p10), %v399_v29, %v398_v28  ;;  %v401_v32 = vld [vmem:[%s1074_s3 + $0x78] sm:$0xff] (!%p230_p10)  ;;  %v613_v34 = vld [vmem:[%s1073_s2] ss:$0 sm:$0xff] (!%p230_p10) }
  0x16   : > { %s269_s10 = scalar_select %p268_p11, %s845_s21, 1  ;;  %v715_v33 = vpack.c.bf16 %v401_v32, %v400_v31 }
  0x17   : > { %698 = vmatpush3.bf16.msra.mxu1 %v697_v14  ;;  %v385_v39 = vld [vmem:[#allocation2] sm:$0xff]  ;;  %s858_s21 = smov [#allocation3]  }
  0x18   : > { %s611_s11 = sshll.u32 %s269_s10, 3  ;;  %699 = vmatprep.subr.bf16.mxu1 %v855_v3  ;;  %s779_s29 = sshll.u32 %s858_s21, 4  ;;  %s780_s29 = int_to_ptr.vmem [resolvable:$false] %s779_s29 }
  0x19   : > { %s271_s14 = scalar_lea.vmem %s1071_s0, %s611_s11  ;;  %s265_s11 = sand.u32 1, %s837_s19  }
  0x1a   : > { %v298_v17 = vld [vmem:[%s271_s14] sm:$0xff]  ;;  %s610_s12 = sshll.u32 %s265_s11, 3  ;;  %s480_s25 = scalar_lea.sflag [#allocation4], %s265_s11 }
  0x1b   : > { %650 = vmatmul.mubr.msk.f32.vlgmr.msra.gmra.mrb[0].mxu0 %vm296_vm1, %v298_v17  ;;  %701 = vmatpush3.bf16.msra.mxu1 %v700_v18  ;;  %s267_s14 = scalar_lea.vmem [#allocation3], %s610_s12  ;;  %s781_s7 = scalar_lea.vmem %s780_s29, 256 }
  0x1c   : > { %702 = vmatprep.subr.bf16.mxu1 %v855_v3  ;;  %s493_s15 = sshll.u32 %s267_s14, 4  ;;  %s1025_s15 = int_to_ptr.vmem [resolvable:$true] %s493_s15 }
  0x1d   : > { %s775_s27 = scalar_lea.vmem %s1025_s15, 128  ;;  %p782_p1 = scmp.lt.s32.totalorder %s1025_s15, %s780_s29 }
  0x1e   : > { %p776_p12 = scmp.ne.s32.totalorder %s1025_s15, %s775_s27  ;;  %p783_p2 = scmp.lt.s32.totalorder %s781_s7, %s775_s27 }
  0x1f   : > { %704 = vmatpush3.bf16.msra.mxu1 %v703_v21 }
  0x20   : > { %705 = vmatprep.subr.bf16.mxu1 %v855_v3  ;;  %p777_p13 = pnand %p776_p12, %p929_p4  ;;  %p784_p3 = por %p783_p2, %p782_p1 }
  0x22   : > { %p778_p0 = pneg %p777_p13 }
  0x23   : > { %707 = vmatpush3.bf16.msra.mxu1 %v706_v24 }
  0x24   : > { %708 = vmatprep.subr.bf16.mxu1 %v855_v3  ;;  %p785_p5 = pnand %p784_p3, %p778_p0 }
  0x27   : > { %710 = vmatpush3.bf16.msra.mxu1 %v709_v27 }
  0x28   : > { %711 = vmatprep.subr.bf16.mxu1 %v855_v3 }
  0x2b   : > { %713 = vmatpush3.bf16.msra.mxu1 %v712_v30 }
  0x2c   : > { %714 = vmatprep.subr.bf16.mxu1 %v855_v3 }
  0x2f   : > { %716 = vmatpush3.bf16.msra.mxu1 %v715_v33 }
  0xee   : > { %v380_v35 = vpop.f32.mrb[0].mxu0 }
  0xef   : > { %v381_v36 = vadd.f32 %v613_v34, %v380_v35  ;;  %v651_v37 = vpop.f32.mrb[1].mxu0 }
  0xf1   : > { %v384_v38 = vmax.f32 %v381_v36, 0.0 }
  0xf3   : > { %685 = vmatmul.mubr.f32.vlgmr.msra.gmra.mrb[0].mxu1 %v384_v38 }
 0x1c6   : > { %v468_v40 = vpop.f32.mrb[0].mxu1 }
 0x1c7   : > { %v472_v41 = vadd.f32 %v468_v40, %v385_v39  ;;  %v686_v42 = vpop.f32.mrb[1].mxu1 }
 0x1c9   : > { %473 = vst.msk [vmem:[#allocation2] sm:$0xff] %vm296_vm1, %v472_v41 }
 0x1d0   : > { %v477_v43 = vld [vmem:[#allocation2] sm:$0xff] }
 0x1d1   : > { %478 = vst.msk [vmem:[%s267_s14] sm:$0xff] %vm296_vm1, %v477_v43 }
 0x1d2   : > { %788 = shalt.err (!%p785_p5)
}
 0x1d3   : > { %s789_s8 = scalar_lea.hbm %s1023_s24, 128  ;;  %s793_s11 = scalar_lea.hbm %s1076_s5, 256 }
 0x1d4   : > { %p790_p6 = scmp.ne.s32.totalorder %s1023_s24, %s789_s8  ;;  %p794_p10 = scmp.lt.u32.totalorder %s1023_s24, %s1076_s5 }
 0x1d5   : > { %p795_p11 = scmp.lt.u32.totalorder %s793_s11, %s789_s8  ;;  %p797_p13 = scmp.lt.u32.totalorder %s789_s8, %s1023_s24 }
 0x1d6   : > { %p791_p7 = pnand %p790_p6, %p929_p4 }
 0x1d7   : > { %p796_p12 = por %p795_p11, %p794_p10 }
 0x1d8   : > { %p792_p9 = pneg %p791_p7 }
 0x1d9   : > { %p798_p0 = por %p797_p13, %p796_p12 }
 0x1db   : > { %p799_p1 = pnand %p798_p0, %p792_p9 }
 0x1dd   : > { %802 = shalt.err (!%p799_p1)
}
 0x1de   : > { %717 = dma.vmem_to_hbm [thread:$0]  (%p929_p4), %s1025_s15, 128, %s1023_s24, %s480_s25  }
 0x1df PF: > { %p723_p2 = scmp.ge.s32.totalorder %s853_s23, 2  ;;  %s505_s14 = sand.u32 1, %s833_s18  }
 0x1e0   : > { %s506_s16 = scalar_lea.sflag [#allocation4], %s505_s14 }
 0x1e1   : > { %p720_p3 = pnand %p723_p2, %p936_p8 }
 0x1e3   : > { %828 = dma.done.wait (!%p720_p3), %s506_s16, 128  }
 0x1e4   : > { %830 = vsyncadd (!%p720_p3), %s506_s16, 4294967168  ;;  %s18_s23 = sadd.s32 1, %s853_s23   ;;  %s1079_s18 = smov %s837_s19 }
 0x1e5   : > { %p15_p5 = scmp.ge.s32.totalorder %s18_s23, 4   ;;  %s1080_s19 = smov %s841_s20 }
 0x1e6   : > { %s1081_s20 = smov %s942_s6  ;;  %s1082_s21 = smov %s849_s22 }
 0x1e7   : > { %s1083_s22 = smov %s1085_s26  ;;  %17 = sbr.rel (!%p15_p5) target bundleno = 4 (0x4), region = 92 }
 0x1ee   :  { %511 = vsyncpa [#allocation4], 1 }
 0x1ef   :  { %513 = vsyncpa [#allocation4 + $0x1], 1 }

</bundles_post_ra>
